<compile_context>
chip_gen: v5e
topology: v5e:2x2
jax: 0.10.0
libtpu: 0.0.40
codegen_flags: <defaults>
</compile_context>

<pallas_src>
import functools
import math

import jax
import jax.numpy as jnp
from jax.experimental import pallas as pl
from jax.experimental.pallas import tpu as pltpu


# ---------------------------------------------------------------------------
# helpers
# ---------------------------------------------------------------------------
def _coset_reduce(x, op, stride, size):
    """Reduce over the lane coset {l + m*stride (mod lanes) : m in [0, size)}.

    Every lane ends up holding its group's full reduction (broadcast), so the
    softmax normalisation is a plain per-lane multiply afterwards.  Rolls run
    on the XLU slot; no (tb, v, out) relayout / reshape is needed.
    """
    if (size & (size - 1)) == 0:            # power-of-two group -> log2 butterfly
        shift = stride
        while shift < stride * size:
            x = op(x, pltpu.roll(x, shift, axis=1))
            shift *= 2
        return x
    acc = x                                  # generic fallback: size-1 rolls
    for m in range(1, size):
        acc = op(acc, pltpu.roll(x, m * stride, axis=1))
    return acc


def _expand_weights(wq, wk, v_dim, out_dim):
    """PyTorch (out_features, emb) weights -> (emb, v_dim*v_dim*out_dim) operands.

    Column c = j*(v*out) + i*out + o of the expanded weights is chosen so that
      (q @ WqT_exp)[b, c] = queries[b, i, j]      (query value broadcast over o)
      (k @ WkT_exp)[b, c] = keys[b, j, o]         (key value tiled over i)
    which turns bmm(queries, relu(keys)) into an elementwise product followed by
    a sum over v_dim lane-aligned 128-wide slices.  Done once per call on tiny
    (emb x 1024) arrays; amortised over every grid step.
    """
    L = v_dim * out_dim
    c = jnp.arange(v_dim * L)
    j_idx = c // L
    i_idx = (c // out_dim) % v_dim
    o_idx = c % out_dim
    wqT_exp = jnp.transpose(wq)[:, i_idx * v_dim + j_idx]    # col c <- Wq row i*v + j
    wkT_exp = jnp.transpose(wk)[:, j_idx * out_dim + o_idx]  # col c <- Wk row j*out + o
    return wqT_exp, wkT_exp


def _pick_batch_block(b, max_block=512):
    """Largest multiple-of-16 divisor of b (bf16 sublane packing) that is
    <= max_block and gives >= 2 grid steps (both v7x TensorCores get work).
    Small / awkward batches run as a single full-batch block."""
    if b < 32:
        return b
    best = b
    blk = 16
    lim = min(max_block, b // 2)
    while blk <= lim:
        if b % blk == 0:
            best = blk
        blk += 16
    return best


# ---------------------------------------------------------------------------
# Fused kernel: projections -> ReLU -> contraction -> scale -> softmax(dim=1)
# ---------------------------------------------------------------------------
def _fused_centext_kernel(q_ref, k_ref, wqe_ref, wke_ref, out_ref, *,
                          v_dim, out_dim, norm_d):
    L = v_dim * out_dim

    # Plain [M,K]x[K,N] GEMMs (bf16 in, fp32 out). RHS is already (emb, v*L):
    # nothing is transposed or relayouted inside the kernel.
    qe = jnp.dot(q_ref[...], wqe_ref[...], preferred_element_type=jnp.float32)
    ke = jnp.dot(k_ref[...], wke_ref[...], preferred_element_type=jnp.float32)

    # qe[b, j*L + i*out + o] = queries[b, i, j]
    # ke[b, j*L + i*out + o] = keys[b, j, o]
    # => bmm(queries, relu(keys)) == sum_j of 128-aligned lane slices of qe*relu(ke).
    p = qe * jnp.maximum(ke, 0.0)                      # ReLU on keys only (as in torch)
    ctx = p[:, 0:L]
    for j in range(1, v_dim):                          # vreg-aligned static slices + adds
        ctx = ctx + p[:, j * L:(j + 1) * L]
    ctx = ctx * norm_d                                 # * 1/sqrt(v_dim)

    # TODO(synk): the self._mask upper-triangular -inf path and the optional `mask`
    # argument of forward() are not implemented (module defaults: mask=False / None).

    # softmax over the v_dim axis (torch F.softmax(dim=1)).  For lane l = i*out + o
    # the group is the stride-out_dim lane coset -> roll butterfly, no relayout.
    m = _coset_reduce(ctx, jnp.maximum, out_dim, v_dim)
    e = jnp.exp(ctx - m)
    s = _coset_reduce(e, jnp.add, out_dim, v_dim)
    out_ref[...] = e * pl.reciprocal(s, approx=True)   # lane-dense 128-wide fp32 store


# ---------------------------------------------------------------------------
# Wrapper
# ---------------------------------------------------------------------------
def _build_pallas_call(b, emb, v_dim, out_dim, batch_block, single_buffer_weights):
    L = v_dim * out_dim
    n_blocks = b // batch_block
    kernel = functools.partial(_fused_centext_kernel, v_dim=v_dim, out_dim=out_dim,
                               norm_d=1.0 / math.sqrt(v_dim))

    def weight_spec():
        shape = (emb, v_dim * L)
        if single_buffer_weights:
            # grid-invariant input (index_map -> (0,0)): one VMEM buffer is enough.
            return pl.BlockSpec(shape, lambda i: (0, 0), pipeline_mode=pl.Buffered(1))
        return pl.BlockSpec(shape, lambda i: (0, 0))

    return pl.pallas_call(
        kernel,
        out_shape=jax.ShapeDtypeStruct((b, L), jnp.float32),
        grid=(n_blocks,),
        in_specs=[
            pl.BlockSpec((batch_block, emb), lambda i: (i, 0)),
            pl.BlockSpec((batch_block, emb), lambda i: (i, 0)),
            weight_spec(),
            weight_spec(),
        ],
        out_specs=pl.BlockSpec((batch_block, L), lambda i: (i, 0)),
        compiler_params=pltpu.CompilerParams(
            dimension_semantics=("parallel",),
            vmem_limit_bytes=32 * 1024 * 1024,   # safe on v5e/v6e/v7x; tiles sized well under it
        ),
    )


def centext_attention(q, k, wq, wk, *, v_dim, out_dim, batch_block=None):
    """q, k: (b, emb); wq: (v_dim*v_dim, emb); wk: (v_dim*out_dim, emb)
    (weights in PyTorch Linear (out_features, in_features) layout).
    Returns softmax(bmm(q@Wq.T, relu(k@Wk.T)) / sqrt(v_dim), dim=1): (b, v_dim, out_dim).
    Note: specialised for small v_dim/out_dim (expanded weights have v_dim^2*out_dim cols)."""
    b, emb = q.shape
    L = v_dim * out_dim
    assert wq.shape == (v_dim * v_dim, emb)
    assert wk.shape == (L, emb)

    if (batch_block is None or batch_block <= 0 or b % batch_block != 0
            or (batch_block != b and batch_block % 16 != 0)):
        batch_block = _pick_batch_block(b)

    # One-time layout work outside the kernel: transpose + column-expand the tiny
    # weights; cast MXU operands to bf16 (fp32 accumulation & softmax in-kernel).
    wqT_exp, wkT_exp = _expand_weights(wq, wk, v_dim, out_dim)
    args = (q.astype(jnp.bfloat16), k.astype(jnp.bfloat16),
            wqT_exp.astype(jnp.bfloat16), wkT_exp.astype(jnp.bfloat16))

    try:
        out_flat = _build_pallas_call(b, emb, v_dim, out_dim, batch_block, True)(*args)
    except Exception:
        # pipeline_mode / pl.Buffered(1) unsupported in this jax version: identical
        # kernel with default double-buffered weight blocks.
        out_flat = _build_pallas_call(b, emb, v_dim, out_dim, batch_block, False)(*args)

    # Free view back to the module's (b, v_dim, out_dim) output shape.
    return out_flat.reshape(b, v_dim, out_dim)


# pure-JAX reference (mirrors the PyTorch forward with mask=False, mask=None)
def centext_attention_ref(q, k, wq, wk, *, v_dim, out_dim):
    b = q.shape[0]
    keys = (k @ wk.T).reshape(b, v_dim, out_dim)
    queries = (q @ wq.T).reshape(b, v_dim, v_dim)
    ctx = jnp.einsum('bij,bjo->bio', queries, jax.nn.relu(keys)) * (1.0 / math.sqrt(v_dim))
    return jax.nn.softmax(ctx, axis=1)


if __name__ == "__main__":
    # small shapes consistent with the module: q, k are (batch, emb_dim)
    B, EMB, V_DIM, OUT_DIM = 4, 32, 8, 16

    key = jax.random.PRNGKey(0)
    kq, kk, kwq, kwk = jax.random.split(key, 4)

    q = jax.random.normal(kq, (B, EMB), dtype=jnp.float32)
    k = jax.random.normal(kk, (B, EMB), dtype=jnp.float32)
    # PyTorch Linear weight layout: (out_features, in_features)
    wq = jax.random.normal(kwq, (V_DIM * V_DIM, EMB), dtype=jnp.float32) / math.sqrt(EMB)
    wk = jax.random.normal(kwk, (V_DIM * OUT_DIM, EMB), dtype=jnp.float32) / math.sqrt(EMB)

    out = centext_attention(q, k, wq, wk, v_dim=V_DIM, out_dim=OUT_DIM)
    out = jax.block_until_ready(out)
    assert out.shape == (B, V_DIM, OUT_DIM)

    # softmax(dim=1) invariant: each (b, o) column sums to 1 (approx reciprocal slack)
    assert jnp.allclose(out.sum(axis=1), 1.0, atol=5e-3), "softmax columns do not sum to 1"

    # tight check against a reference fed the same bf16-quantised operands
    bf = lambda x: x.astype(jnp.bfloat16).astype(jnp.float32)
    ref_bf16 = centext_attention_ref(bf(q), bf(k), bf(wq), bf(wk), v_dim=V_DIM, out_dim=OUT_DIM)
    assert jnp.allclose(out, ref_bf16, atol=5e-3, rtol=5e-3), "mismatch vs bf16-matched reference"

    # sanity check against the pure-fp32 reference (bf16 operands -> relaxed tolerance)
    ref = centext_attention_ref(q, k, wq, wk, v_dim=V_DIM, out_dim=OUT_DIM)
    assert jnp.allclose(out, ref, atol=5e-2, rtol=5e-2), "mismatch vs fp32 reference"
    print("KERNEL_OK")
</pallas_src>

<mosaic_0001>
module attributes {stable_mosaic.version = 11 : i64} {
  func.func @_fused_centext_kernel(%arg0: i32, %arg1: memref<4x32xbf16, #tpu.memory_space<vmem>>, %arg2: memref<4x32xbf16, #tpu.memory_space<vmem>>, %arg3: memref<32x1024xbf16, #tpu.memory_space<vmem>>, %arg4: memref<32x1024xbf16, #tpu.memory_space<vmem>>, %arg5: memref<4x128xf32, #tpu.memory_space<vmem>>) attributes {dimension_semantics = [#tpu.dimension_semantics<parallel>], iteration_bounds = array<i64: 1>, scalar_prefetch = 0 : i64, scratch_operands = 0 : i64, tpu.core_type = #tpu.core_type<tc>, window_params = [{transform_indices = @transform_0, window_bounds = array<i64: 4, 32>}, {transform_indices = @transform_1, window_bounds = array<i64: 4, 32>}, {pipeline_mode = #tpu.pipeline_mode<synchronous>, transform_indices = @transform_2, window_bounds = array<i64: 32, 1024>}, {pipeline_mode = #tpu.pipeline_mode<synchronous>, transform_indices = @transform_3, window_bounds = array<i64: 32, 1024>}, {transform_indices = @transform_4, window_bounds = array<i64: 4, 128>}]} {
    %c0 = arith.constant 0 : index
    %c0_0 = arith.constant 0 : index
    %0 = vector.load %arg1[%c0, %c0_0] : memref<4x32xbf16, #tpu.memory_space<vmem>>, vector<4x32xbf16>
    %c0_1 = arith.constant 0 : index
    %c0_2 = arith.constant 0 : index
    %1 = vector.load %arg3[%c0_1, %c0_2] : memref<32x1024xbf16, #tpu.memory_space<vmem>>, vector<32x1024xbf16>
    %cst = arith.constant dense<0.000000e+00> : vector<4x1024xf32>
    %2 = tpu.matmul %0, %1, %cst {dimension_numbers = #tpu.dot_dimension_numbers<[1], [0], [0], [1], [0, 0, 1, 1], [], []>} : vector<4x32xbf16>, vector<32x1024xbf16>, vector<4x1024xf32> -> vector<4x1024xf32>
    %c0_3 = arith.constant 0 : index
    %c0_4 = arith.constant 0 : index
    %3 = vector.load %arg2[%c0_3, %c0_4] : memref<4x32xbf16, #tpu.memory_space<vmem>>, vector<4x32xbf16>
    %c0_5 = arith.constant 0 : index
    %c0_6 = arith.constant 0 : index
    %4 = vector.load %arg4[%c0_5, %c0_6] : memref<32x1024xbf16, #tpu.memory_space<vmem>>, vector<32x1024xbf16>
    %cst_7 = arith.constant dense<0.000000e+00> : vector<4x1024xf32>
    %5 = tpu.matmul %3, %4, %cst_7 {dimension_numbers = #tpu.dot_dimension_numbers<[1], [0], [0], [1], [0, 0, 1, 1], [], []>} : vector<4x32xbf16>, vector<32x1024xbf16>, vector<4x1024xf32> -> vector<4x1024xf32>
    %cst_8 = arith.constant 0.000000e+00 : f32
    %6 = vector.broadcast %cst_8 : f32 to vector<4x1024xf32>
    %7 = arith.maximumf %5, %6 : vector<4x1024xf32>
    %8 = arith.mulf %2, %7 : vector<4x1024xf32>
    %9 = vector.extract_strided_slice %8 {offsets = [0, 0], sizes = [4, 128], strides = [1, 1]} : vector<4x1024xf32> to vector<4x128xf32>
    %10 = vector.extract_strided_slice %8 {offsets = [0, 128], sizes = [4, 128], strides = [1, 1]} : vector<4x1024xf32> to vector<4x128xf32>
    %11 = arith.addf %9, %10 : vector<4x128xf32>
    %12 = vector.extract_strided_slice %8 {offsets = [0, 256], sizes = [4, 128], strides = [1, 1]} : vector<4x1024xf32> to vector<4x128xf32>
    %13 = arith.addf %11, %12 : vector<4x128xf32>
    %14 = vector.extract_strided_slice %8 {offsets = [0, 384], sizes = [4, 128], strides = [1, 1]} : vector<4x1024xf32> to vector<4x128xf32>
    %15 = arith.addf %13, %14 : vector<4x128xf32>
    %16 = vector.extract_strided_slice %8 {offsets = [0, 512], sizes = [4, 128], strides = [1, 1]} : vector<4x1024xf32> to vector<4x128xf32>
    %17 = arith.addf %15, %16 : vector<4x128xf32>
    %18 = vector.extract_strided_slice %8 {offsets = [0, 640], sizes = [4, 128], strides = [1, 1]} : vector<4x1024xf32> to vector<4x128xf32>
    %19 = arith.addf %17, %18 : vector<4x128xf32>
    %20 = vector.extract_strided_slice %8 {offsets = [0, 768], sizes = [4, 128], strides = [1, 1]} : vector<4x1024xf32> to vector<4x128xf32>
    %21 = arith.addf %19, %20 : vector<4x128xf32>
    %22 = vector.extract_strided_slice %8 {offsets = [0, 896], sizes = [4, 128], strides = [1, 1]} : vector<4x1024xf32> to vector<4x128xf32>
    %23 = arith.addf %21, %22 : vector<4x128xf32>
    %cst_9 = arith.constant 0.353553385 : f32
    %24 = vector.broadcast %cst_9 : f32 to vector<4x128xf32>
    %25 = arith.mulf %23, %24 : vector<4x128xf32>
    %c16_i32 = arith.constant 16 : i32
    %26 = tpu.dynamic_rotate %25 by %c16_i32 dim 1 : vector<4x128xf32>, i32 -> vector<4x128xf32>
    %27 = arith.maximumf %25, %26 : vector<4x128xf32>
    %c32_i32 = arith.constant 32 : i32
    %28 = tpu.dynamic_rotate %27 by %c32_i32 dim 1 : vector<4x128xf32>, i32 -> vector<4x128xf32>
    %29 = arith.maximumf %27, %28 : vector<4x128xf32>
    %c64_i32 = arith.constant 64 : i32
    %30 = tpu.dynamic_rotate %29 by %c64_i32 dim 1 : vector<4x128xf32>, i32 -> vector<4x128xf32>
    %31 = arith.maximumf %29, %30 : vector<4x128xf32>
    %32 = arith.subf %25, %31 : vector<4x128xf32>
    %33 = math.exp %32 : vector<4x128xf32>
    %c16_i32_10 = arith.constant 16 : i32
    %34 = tpu.dynamic_rotate %33 by %c16_i32_10 dim 1 : vector<4x128xf32>, i32 -> vector<4x128xf32>
    %35 = arith.addf %33, %34 : vector<4x128xf32>
    %c32_i32_11 = arith.constant 32 : i32
    %36 = tpu.dynamic_rotate %35 by %c32_i32_11 dim 1 : vector<4x128xf32>, i32 -> vector<4x128xf32>
    %37 = arith.addf %35, %36 : vector<4x128xf32>
    %c64_i32_12 = arith.constant 64 : i32
    %38 = tpu.dynamic_rotate %37 by %c64_i32_12 dim 1 : vector<4x128xf32>, i32 -> vector<4x128xf32>
    %39 = arith.addf %37, %38 : vector<4x128xf32>
    %40 = tpu.reciprocal %39 {approx = true} : vector<4x128xf32> -> vector<4x128xf32>
    %41 = arith.mulf %33, %40 : vector<4x128xf32>
    %c0_13 = arith.constant 0 : index
    %c0_14 = arith.constant 0 : index
    %42 = vector.load %arg5[%c0_13, %c0_14] : memref<4x128xf32, #tpu.memory_space<vmem>>, vector<4x128xf32>
    tpu.vector_store %arg5[%c0_13, %c0_14], %41 {strides = array<i32>} : memref<4x128xf32, #tpu.memory_space<vmem>>, vector<4x128xf32>,
    return
  }
  func.func @transform_0(%arg0: i32) -> (i32, i32) {
    %c0_i32 = arith.constant 0 : i32
    %c0_i32_0 = arith.constant 0 : i32
    return %arg0, %c0_i32 : i32, i32
  }
  func.func @transform_1(%arg0: i32) -> (i32, i32) {
    %c0_i32 = arith.constant 0 : i32
    %c0_i32_0 = arith.constant 0 : i32
    return %arg0, %c0_i32 : i32, i32
  }
  func.func @transform_2(%arg0: i32) -> (i32, i32) {
    %c0_i32 = arith.constant 0 : i32
    %c0_i32_0 = arith.constant 0 : i32
    %c0_i32_1 = arith.constant 0 : i32
    return %c0_i32, %c0_i32_0 : i32, i32
  }
  func.func @transform_3(%arg0: i32) -> (i32, i32) {
    %c0_i32 = arith.constant 0 : i32
    %c0_i32_0 = arith.constant 0 : i32
    %c0_i32_1 = arith.constant 0 : i32
    return %c0_i32, %c0_i32_0 : i32, i32
  }
  func.func @transform_4(%arg0: i32) -> (i32, i32) {
    %c0_i32 = arith.constant 0 : i32
    %c0_i32_0 = arith.constant 0 : i32
    return %arg0, %c0_i32 : i32, i32
  }
}

module attributes {stable_mosaic.version = 11 : i64} {
  func.func @_fused_centext_kernel(%arg0: i32, %arg1: memref<4x32xbf16, #tpu.memory_space<vmem>>, %arg2: memref<4x32xbf16, #tpu.memory_space<vmem>>, %arg3: memref<32x1024xbf16, #tpu.memory_space<vmem>>, %arg4: memref<32x1024xbf16, #tpu.memory_space<vmem>>, %arg5: memref<4x128xf32, #tpu.memory_space<vmem>>) attributes {dimension_semantics = [#tpu.dimension_semantics<parallel>], iteration_bounds = array<i64: 1>, scalar_prefetch = 0 : i64, scratch_operands = 0 : i64, tpu.core_type = #tpu.core_type<tc>, window_params = [{transform_indices = @transform_0, window_bounds = array<i64: 4, 32>}, {transform_indices = @transform_1, window_bounds = array<i64: 4, 32>}, {pipeline_mode = #tpu.pipeline_mode<synchronous>, transform_indices = @transform_2, window_bounds = array<i64: 32, 1024>}, {pipeline_mode = #tpu.pipeline_mode<synchronous>, transform_indices = @transform_3, window_bounds = array<i64: 32, 1024>}, {transform_indices = @transform_4, window_bounds = array<i64: 4, 128>}]} {
    %c0 = arith.constant 0 : index
    %c0_0 = arith.constant 0 : index
    %0 = vector.load %arg1[%c0, %c0_0] : memref<4x32xbf16, #tpu.memory_space<vmem>>, vector<4x32xbf16>
    %c0_1 = arith.constant 0 : index
    %c0_2 = arith.constant 0 : index
    %1 = vector.load %arg3[%c0_1, %c0_2] : memref<32x1024xbf16, #tpu.memory_space<vmem>>, vector<32x1024xbf16>
    %cst = arith.constant dense<0.000000e+00> : vector<4x1024xf32>
    %2 = tpu.matmul %0, %1, %cst {dimension_numbers = #tpu.dot_dimension_numbers<[1], [0], [0], [1], [0, 0, 1, 1], [], []>} : vector<4x32xbf16>, vector<32x1024xbf16>, vector<4x1024xf32> -> vector<4x1024xf32>
    %c0_3 = arith.constant 0 : index
    %c0_4 = arith.constant 0 : index
    %3 = vector.load %arg2[%c0_3, %c0_4] : memref<4x32xbf16, #tpu.memory_space<vmem>>, vector<4x32xbf16>
    %c0_5 = arith.constant 0 : index
    %c0_6 = arith.constant 0 : index
    %4 = vector.load %arg4[%c0_5, %c0_6] : memref<32x1024xbf16, #tpu.memory_space<vmem>>, vector<32x1024xbf16>
    %cst_7 = arith.constant dense<0.000000e+00> : vector<4x1024xf32>
    %5 = tpu.matmul %3, %4, %cst_7 {dimension_numbers = #tpu.dot_dimension_numbers<[1], [0], [0], [1], [0, 0, 1, 1], [], []>} : vector<4x32xbf16>, vector<32x1024xbf16>, vector<4x1024xf32> -> vector<4x1024xf32>
    %cst_8 = arith.constant 0.000000e+00 : f32
    %6 = vector.broadcast %cst_8 : f32 to vector<4x1024xf32>
    %7 = arith.maximumf %5, %6 : vector<4x1024xf32>
    %8 = arith.mulf %2, %7 : vector<4x1024xf32>
    %9 = vector.extract_strided_slice %8 {offsets = [0, 0], sizes = [4, 128], strides = [1, 1]} : vector<4x1024xf32> to vector<4x128xf32>
    %10 = vector.extract_strided_slice %8 {offsets = [0, 128], sizes = [4, 128], strides = [1, 1]} : vector<4x1024xf32> to vector<4x128xf32>
    %11 = arith.addf %9, %10 : vector<4x128xf32>
    %12 = vector.extract_strided_slice %8 {offsets = [0, 256], sizes = [4, 128], strides = [1, 1]} : vector<4x1024xf32> to vector<4x128xf32>
    %13 = arith.addf %11, %12 : vector<4x128xf32>
    %14 = vector.extract_strided_slice %8 {offsets = [0, 384], sizes = [4, 128], strides = [1, 1]} : vector<4x1024xf32> to vector<4x128xf32>
    %15 = arith.addf %13, %14 : vector<4x128xf32>
    %16 = vector.extract_strided_slice %8 {offsets = [0, 512], sizes = [4, 128], strides = [1, 1]} : vector<4x1024xf32> to vector<4x128xf32>
    %17 = arith.addf %15, %16 : vector<4x128xf32>
    %18 = vector.extract_strided_slice %8 {offsets = [0, 640], sizes = [4, 128], strides = [1, 1]} : vector<4x1024xf32> to vector<4x128xf32>
    %19 = arith.addf %17, %18 : vector<4x128xf32>
    %20 = vector.extract_strided_slice %8 {offsets = [0, 768], sizes = [4, 128], strides = [1, 1]} : vector<4x1024xf32> to vector<4x128xf32>
    %21 = arith.addf %19, %20 : vector<4x128xf32>
    %22 = vector.extract_strided_slice %8 {offsets = [0, 896], sizes = [4, 128], strides = [1, 1]} : vector<4x1024xf32> to vector<4x128xf32>
    %23 = arith.addf %21, %22 : vector<4x128xf32>
    %cst_9 = arith.constant 0.353553385 : f32
    %24 = vector.broadcast %cst_9 : f32 to vector<4x128xf32>
    %25 = arith.mulf %23, %24 : vector<4x128xf32>
    %c16_i32 = arith.constant 16 : i32
    %26 = tpu.dynamic_rotate %25 by %c16_i32 dim 1 : vector<4x128xf32>, i32 -> vector<4x128xf32>
    %27 = arith.maximumf %25, %26 : vector<4x128xf32>
    %c32_i32 = arith.constant 32 : i32
    %28 = tpu.dynamic_rotate %27 by %c32_i32 dim 1 : vector<4x128xf32>, i32 -> vector<4x128xf32>
    %29 = arith.maximumf %27, %28 : vector<4x128xf32>
    %c64_i32 = arith.constant 64 : i32
    %30 = tpu.dynamic_rotate %29 by %c64_i32 dim 1 : vector<4x128xf32>, i32 -> vector<4x128xf32>
    %31 = arith.maximumf %29, %30 : vector<4x128xf32>
    %32 = arith.subf %25, %31 : vector<4x128xf32>
    %33 = math.exp %32 : vector<4x128xf32>
    %c16_i32_10 = arith.constant 16 : i32
    %34 = tpu.dynamic_rotate %33 by %c16_i32_10 dim 1 : vector<4x128xf32>, i32 -> vector<4x128xf32>
    %35 = arith.addf %33, %34 : vector<4x128xf32>
    %c32_i32_11 = arith.constant 32 : i32
    %36 = tpu.dynamic_rotate %35 by %c32_i32_11 dim 1 : vector<4x128xf32>, i32 -> vector<4x128xf32>
    %37 = arith.addf %35, %36 : vector<4x128xf32>
    %c64_i32_12 = arith.constant 64 : i32
    %38 = tpu.dynamic_rotate %37 by %c64_i32_12 dim 1 : vector<4x128xf32>, i32 -> vector<4x128xf32>
    %39 = arith.addf %37, %38 : vector<4x128xf32>
    %40 = tpu.reciprocal %39 {approx = true} : vector<4x128xf32> -> vector<4x128xf32>
    %41 = arith.mulf %33, %40 : vector<4x128xf32>
    %c0_13 = arith.constant 0 : index
    %c0_14 = arith.constant 0 : index
    %42 = vector.load %arg5[%c0_13, %c0_14] : memref<4x128xf32, #tpu.memory_space<vmem>>, vector<4x128xf32>
    tpu.vector_store %arg5[%c0_13, %c0_14], %41 {strides = array<i32>} : memref<4x128xf32, #tpu.memory_space<vmem>>, vector<4x128xf32>,
    return
  }
  func.func @transform_0(%arg0: i32) -> (i32, i32) {
    %c0_i32 = arith.constant 0 : i32
    %c0_i32_0 = arith.constant 0 : i32
    return %arg0, %c0_i32 : i32, i32
  }
  func.func @transform_1(%arg0: i32) -> (i32, i32) {
    %c0_i32 = arith.constant 0 : i32
    %c0_i32_0 = arith.constant 0 : i32
    return %arg0, %c0_i32 : i32, i32
  }
  func.func @transform_2(%arg0: i32) -> (i32, i32) {
    %c0_i32 = arith.constant 0 : i32
    %c0_i32_0 = arith.constant 0 : i32
    %c0_i32_1 = arith.constant 0 : i32
    return %c0_i32, %c0_i32_0 : i32, i32
  }
  func.func @transform_3(%arg0: i32) -> (i32, i32) {
    %c0_i32 = arith.constant 0 : i32
    %c0_i32_0 = arith.constant 0 : i32
    %c0_i32_1 = arith.constant 0 : i32
    return %c0_i32, %c0_i32_0 : i32, i32
  }
  func.func @transform_4(%arg0: i32) -> (i32, i32) {
    %c0_i32 = arith.constant 0 : i32
    %c0_i32_0 = arith.constant 0 : i32
    return %arg0, %c0_i32 : i32, i32
  }
}

</mosaic_0001>

<bundles_post_ra>
// kernel: tpu_custom_call.1
= control target key start
LH: loop header
LB: loop body
LE: loop exit
PB: predicated region body
PF: predicated region fallthrough
CT: control target
= control target key end

     0   :  { %9 = vsyncpa [#allocation3], 0  ;;  %s950_s0 = inlined_call_operand.hbm [shape: bf16[4,32], index: 0, kind: input, shape index: {}]   ;;  %s951_s1 = inlined_call_operand.hbm [shape: bf16[4,32], index: 1, kind: input, shape index: {}]   ;;  %s952_s2 = inlined_call_operand.hbm [shape: bf16[32,1024], index: 2, kind: input, shape index: {}]   ;;  %s953_s3 = inlined_call_operand.hbm [shape: bf16[32,1024], index: 3, kind: input, shape index: {}]   ;;  %s954_s4 = inlined_call_operand.hbm [shape: f32[4,128], index: 4, kind: output, shape index: {}]  }
   0x1   :  { %10 = vsyncpa [#allocation6], 0 }
   0x2   :  { %11 = vsyncpa [#allocation9], 0  ;;  %s29_s17 = sshll.u32 %s951_s1, 4  ;;  %s30_s17 = int_to_ptr.hbm [resolvable:$true] %s29_s17 }
   0x3   :  { %12 = vsyncpa [#allocation4], 0  ;;  %s871_s18 = smov [#allocation5]   ;;  %s18_s22 = sshll.u32 %s950_s0, 4  ;;  %s19_s22 = int_to_ptr.hbm [resolvable:$true] %s18_s22 }
   0x4   :  { %s31_s19 = sshll.u32 %s871_s18, 4  ;;  %s872_s23 = smov [#allocation2]   ;;  %s32_s19 = int_to_ptr.vmem [resolvable:$true] %s31_s19 }
   0x5   :  { %34 = dma.hbm_to_vmem [thread:$0]  %s30_s17, 32, %s32_s19, [#allocation6]  }
   0x6   :  { %s20_s24 = sshll.u32 %s872_s23, 4  ;;  %s39_s27 = sshll.u32 %s952_s2, 4  ;;  %s21_s24 = int_to_ptr.vmem [resolvable:$true] %s20_s24  ;;  %s40_s27 = int_to_ptr.hbm [resolvable:$true] %s39_s27 }
   0x7   :  { %23 = dma.hbm_to_vmem [thread:$0]  %s19_s22, 32, %s21_s24, [#allocation3]  }
   0x8   :  { %s873_s1 = smov [#allocation7]   ;;  %s52_s5 = sshll.u32 %s953_s3, 4  ;;  %s53_s5 = int_to_ptr.hbm [resolvable:$true] %s52_s5 }
   0x9   :  { %s41_s28 = sshll.u32 %s873_s1, 4  ;;  %s874_s6 = smov 512   ;;  %s42_s28 = int_to_ptr.vmem [resolvable:$true] %s41_s28 }
   0xa   :  { %s875_s0 = smov 32   ;;  %s876_s7 = smov [#allocation8]  }
   0xb   :  { %47 = dma.hbm_to_vmem [thread:$0]  %s40_s27, 2048, %s42_s28, [#allocation6], %s874_s6, %s874_s6, %s875_s0  }
   0xc   :  { %s54_s8 = sshll.u32 %s876_s7, 4  ;;  %s55_s8 = int_to_ptr.vmem [resolvable:$true] %s54_s8 }
   0xd   :  { %60 = dma.hbm_to_vmem [thread:$0]  %s53_s5, 2048, %s55_s8, [#allocation9], %s874_s6, %s874_s6, %s875_s0  }
   0xe   :  { %863 = dma.done.wait [#allocation3], 32  }
   0xf   :  { %864 = vsyncadd [#allocation3], 4294967264 }
  0x10   :  { %865 = dma.done.wait [#allocation6], 2080  }
  0x11   :  { %866 = vsyncadd [#allocation6], 4294965216 }
  0x12   :  { %867 = dma.done.wait [#allocation9], 2048  }
  0x13   :  { %868 = vsyncadd [#allocation9], 4294965248  ;;  %vm175_vm0 = vcmask 261120   ;;  %v588_v0 = vld [vmem:[#allocation7 + $0x40] sm:$0xf]  ;;  %s877_s2 = smov 16  }
  0x14   :  { %v710_v1 = vld [vmem:[#allocation7 + $0x5c] sm:$0xf0]  ;;  %v706_v2 = vld [vmem:[#allocation7 + $0x44] sm:$0xf]  ;;  %v596_v5 = vld [vmem:[#allocation7 + $0x48] sm:$0xf] }
  0x15   :  { %v589_v3 = vor.u32 %v710_v1, %v588_v0  ;;  %v590_v4 = vld [vmem:[#allocation7 + $0x60] sm:$0xf0]  ;;  %v711_v6 = vld [vmem:[#allocation7 + $0x64] sm:$0xf0]  ;;  %v707_v9 = vld [vmem:[#allocation7 + $0x4c] sm:$0xf] }
  0x16   :  { %v593_v7 = vor.u32 %v706_v2, %v590_v4  ;;  %v597_v8 = vor.u32 %v711_v6, %v596_v5  ;;  %v598_v10 = vld [vmem:[#allocation7 + $0x68] sm:$0xf0]  ;;  %v556_v11 = vld [vmem:[#allocation7] sm:$0xf]  ;;  %v698_v14 = vld [vmem:[#allocation7 + $0x4] sm:$0xf] }
  0x17   :  { %185 = vmatpush.bf16.msra.mxu0 %v589_v3  ;;  %v601_v12 = vor.u32 %v707_v9, %v598_v10  ;;  %v702_v13 = vld [vmem:[#allocation7 + $0x1c] sm:$0xf0]  ;;  %v558_v15 = vld [vmem:[#allocation7 + $0x20] sm:$0xf0]  ;;  %v564_v18 = vld [vmem:[#allocation7 + $0x8] sm:$0xf] }
  0x18   :  { %198 = vmatpush.bf16.msra.mxu1 %v593_v7  ;;  %211 = vmatpush.bf16.msra.mxu2 %v597_v8  ;;  %v557_v16 = vor.u32 %v702_v13, %v556_v11  ;;  %v561_v17 = vor.u32 %v698_v14, %v558_v15  ;;  %v703_v19 = vld [vmem:[#allocation7 + $0x24] sm:$0xf0]  ;;  %v699_v20 = vld [vmem:[#allocation7 + $0xc] sm:$0xf]  ;;  %v919_v23 = vld [vmem:[#allocation2] sm:$0x3] }
  0x19   :  { %224 = vmatpush.bf16.msra.mxu3 %v601_v12  ;;  %v565_v21 = vor.u32 %v703_v19, %v564_v18  ;;  %v566_v22 = vld [vmem:[#allocation7 + $0x28] sm:$0xf0]  ;;  %v612_v24 = vld [vmem:[#allocation7 + $0x58] sm:$0xf]  ;;  %v604_v27 = vld [vmem:[#allocation7 + $0x50] sm:$0xf] }
  0x1a   :  { %v569_v25 = vor.u32 %v699_v20, %v566_v22  ;;  %v713_v26 = vld [vmem:[#allocation7 + $0x74] sm:$0xf0]  ;;  %v712_v28 = vld [vmem:[#allocation7 + $0x6c] sm:$0xf0]  ;;  %v709_v30 = vld [vmem:[#allocation7 + $0x5c] sm:$0xf] }
  0x1b   :  { %186 = vmatpush.bf16.msra.mxu0 %v557_v16  ;;  %v613_v29 = vor.u32 %v713_v26, %v612_v24  ;;  %v614_v31 = vld [vmem:[#allocation7 + $0x78] sm:$0xf0]  ;;  %v708_v32 = vld [vmem:[#allocation7 + $0x54] sm:$0xf]  ;;  %v605_v33 = vor.u32 %v712_v28, %v604_v27  ;;  %v580_v36 = vld [vmem:[#allocation7 + $0x18] sm:$0xf] }
  0x1c   :  { %199 = vmatpush.bf16.msra.mxu1 %v561_v17  ;;  %212 = vmatpush.bf16.msra.mxu2 %v565_v21  ;;  %v617_v34 = vor.u32 %v709_v30, %v614_v31  ;;  %v606_v35 = vld [vmem:[#allocation7 + $0x70] sm:$0xf0]  ;;  %v705_v37 = vld [vmem:[#allocation7 + $0x34] sm:$0xf0]  ;;  %v572_v40 = vld [vmem:[#allocation7 + $0x10] sm:$0xf] }
  0x1d   :  { %225 = vmatpush.bf16.msra.mxu3 %v569_v25  ;;  %v609_v38 = vor.u32 %v708_v32, %v606_v35  ;;  %v581_v39 = vor.u32 %v705_v37, %v580_v36  ;;  %v704_v41 = vld [vmem:[#allocation7 + $0x2c] sm:$0xf0]  ;;  %v701_v42 = vld [vmem:[#allocation7 + $0x1c] sm:$0xf]  ;;  %v700_v44 = vld [vmem:[#allocation7 + $0x14] sm:$0xf] }
  0x1e   :  { %618 = vmatmul.msk.bf16.vlgmr.msra.gmra.mxu0 %vm175_vm0, %v919_v23  ;;  %v582_v43 = vld [vmem:[#allocation7 + $0x38] sm:$0xf0]  ;;  %v574_v45 = vld [vmem:[#allocation7 + $0x30] sm:$0xf0]  ;;  %v668_v47 = vld [vmem:[#allocation8 + $0x48] sm:$0xf]  ;;  %v573_v50 = vor.u32 %v704_v41, %v572_v40 }
  0x1f   :  { %619 = vmatmul.msk.bf16.vlgmr.msra.gmra.mxu1 %vm175_vm0, %v919_v23  ;;  %620 = vmatmul.msk.bf16.vlgmr.msra.gmra.mxu2 %vm175_vm0, %v919_v23  ;;  %v585_v46 = vor.u32 %v701_v42, %v582_v43  ;;  %v727_v48 = vld [vmem:[#allocation8 + $0x64] sm:$0xf0]  ;;  %v660_v49 = vld [vmem:[#allocation8 + $0x40] sm:$0xf]  ;;  %v723_v53 = vld [vmem:[#allocation8 + $0x4c] sm:$0xf]  ;;  %v577_v55 = vor.u32 %v700_v44, %v574_v45 }
  0x20   :  { %263 = vmatpush.bf16.msrb.mxu2 %v613_v29  ;;  %621 = vmatmul.msk.bf16.vlgmr.msra.gmra.mxu3 %vm175_vm0, %v919_v23  ;;  %v669_v51 = vor.u32 %v727_v48, %v668_v47  ;;  %v726_v52 = vld [vmem:[#allocation8 + $0x5c] sm:$0xf0]  ;;  %v670_v54 = vld [vmem:[#allocation8 + $0x68] sm:$0xf0]  ;;  %v722_v58 = vld [vmem:[#allocation8 + $0x44] sm:$0xf] }
  0x21   :  { %276 = vmatpush.bf16.msrb.mxu3 %v617_v34  ;;  %237 = vmatpush.bf16.msrb.mxu0 %v605_v33  ;;  %v661_v56 = vor.u32 %v726_v52, %v660_v49  ;;  %v673_v57 = vor.u32 %v723_v53, %v670_v54  ;;  %v662_v59 = vld [vmem:[#allocation8 + $0x60] sm:$0xf0]  ;;  %v636_v60 = vld [vmem:[#allocation8 + $0x8] sm:$0xf]  ;;  %v628_v63 = vld [vmem:[#allocation8] sm:$0xf] }
  0x22   :  { %250 = vmatpush.bf16.msrb.mxu1 %v609_v38  ;;  %v665_v61 = vor.u32 %v722_v58, %v662_v59  ;;  %v719_v62 = vld [vmem:[#allocation8 + $0x24] sm:$0xf0]  ;;  %v718_v0 = vld [vmem:[#allocation8 + $0x1c] sm:$0xf0]  ;;  %v715_v2 = vld [vmem:[#allocation8 + $0xc] sm:$0xf] }
  0x23   :  { %v637_v1 = vor.u32 %v719_v62, %v636_v60  ;;  %v638_v3 = vld [vmem:[#allocation8 + $0x28] sm:$0xf0]  ;;  %v714_v4 = vld [vmem:[#allocation8 + $0x4] sm:$0xf]  ;;  %v629_v7 = vor.u32 %v718_v0, %v628_v63  ;;  %v684_v9 = vld [vmem:[#allocation8 + $0x58] sm:$0xf] }
  0x24   :  { %264 = vmatpush.bf16.msrb.mxu2 %v581_v39  ;;  %v641_v5 = vor.u32 %v715_v2, %v638_v3  ;;  %v630_v6 = vld [vmem:[#allocation8 + $0x20] sm:$0xf0]  ;;  %v729_v10 = vld [vmem:[#allocation8 + $0x74] sm:$0xf0]  ;;  %v676_v11 = vld [vmem:[#allocation8 + $0x50] sm:$0xf] }
  0x25   :  { %277 = vmatpush.bf16.msrb.mxu3 %v585_v46  ;;  %238 = vmatpush.bf16.msrb.mxu0 %v573_v50  ;;  %v633_v8 = vor.u32 %v714_v4, %v630_v6  ;;  %v728_v12 = vld [vmem:[#allocation8 + $0x6c] sm:$0xf0]  ;;  %v725_v13 = vld [vmem:[#allocation8 + $0x5c] sm:$0xf]  ;;  %v724_v15 = vld [vmem:[#allocation8 + $0x54] sm:$0xf]  ;;  %v685_v17 = vor.u32 %v729_v10, %v684_v9 }
  0x26   :  { %251 = vmatpush.bf16.msrb.mxu1 %v577_v55  ;;  %v686_v14 = vld [vmem:[#allocation8 + $0x78] sm:$0xf0]  ;;  %v678_v16 = vld [vmem:[#allocation8 + $0x70] sm:$0xf0]  ;;  %v677_v18 = vor.u32 %v728_v12, %v676_v11  ;;  %v652_v20 = vld [vmem:[#allocation8 + $0x18] sm:$0xf] }
  0x27   :  { %v689_v19 = vor.u32 %v725_v13, %v686_v14  ;;  %v721_v21 = vld [vmem:[#allocation8 + $0x34] sm:$0xf0]  ;;  %v644_v22 = vld [vmem:[#allocation8 + $0x10] sm:$0xf]  ;;  %v681_v24 = vor.u32 %v724_v15, %v678_v16  ;;  %v717_v26 = vld [vmem:[#allocation8 + $0x1c] sm:$0xf] }
  0x28   :  { %415 = vmatpush.bf16.msra.mxu2 %v669_v51  ;;  %v720_v25 = vld [vmem:[#allocation8 + $0x2c] sm:$0xf0]  ;;  %v654_v27 = vld [vmem:[#allocation8 + $0x38] sm:$0xf0]  ;;  %v716_v28 = vld [vmem:[#allocation8 + $0x14] sm:$0xf]  ;;  %v653_v30 = vor.u32 %v721_v21, %v652_v20 }
  0x29   :  { %428 = vmatpush.bf16.msra.mxu3 %v673_v57  ;;  %389 = vmatpush.bf16.msra.mxu0 %v661_v56  ;;  %v646_v29 = vld [vmem:[#allocation8 + $0x30] sm:$0xf0]  ;;  %v645_v31 = vor.u32 %v720_v25, %v644_v22  ;;  %v657_v32 = vor.u32 %v717_v26, %v654_v27  ;;  %v283_v34 = vld [vmem:[#allocation5] sm:$0x3]  ;;  %s878_s3 = smov 64   ;;  %s879_s9 = smov [#allocation10]  }
  0x2a   :  { %402 = vmatpush.bf16.msra.mxu1 %v665_v61  ;;  %v649_v33 = vor.u32 %v716_v28, %v646_v29  ;;  %s540_s10 = sshll.u32 %s879_s9, 4  ;;  %s542_s13 = sshll.u32 %s954_s4, 4  ;;  %s541_s10 = int_to_ptr.vmem [resolvable:$true] %s540_s10  ;;  %s543_s13 = int_to_ptr.hbm [resolvable:$true] %s542_s13 }
  0x2c   :  { %416 = vmatpush.bf16.msra.mxu2 %v637_v1 }
  0x2d   :  { %429 = vmatpush.bf16.msra.mxu3 %v641_v5  ;;  %390 = vmatpush.bf16.msra.mxu0 %v629_v7 }
  0x2e   :  { %403 = vmatpush.bf16.msra.mxu1 %v633_v8  ;;  %622 = vmatmul.msk.bf16.vlgmr.msrb.gmra.mxu0 %vm175_vm0, %v919_v23 }
  0x2f   :  { %623 = vmatmul.msk.bf16.vlgmr.msrb.gmra.mxu1 %vm175_vm0, %v919_v23  ;;  %624 = vmatmul.msk.bf16.vlgmr.msrb.gmra.mxu2 %vm175_vm0, %v919_v23 }
  0x30   :  { %625 = vmatmul.msk.bf16.vlgmr.msrb.gmra.mxu3 %vm175_vm0, %v919_v23  ;;  %467 = vmatpush.bf16.msrb.mxu2 %v685_v17 }
  0x31   :  { %441 = vmatpush.bf16.msrb.mxu0 %v677_v18  ;;  %480 = vmatpush.bf16.msrb.mxu3 %v689_v19 }
  0x32   :  { %454 = vmatpush.bf16.msrb.mxu1 %v681_v24 }
  0x34   :  { %468 = vmatpush.bf16.msrb.mxu2 %v653_v30 }
  0x35   :  { %442 = vmatpush.bf16.msrb.mxu0 %v645_v31  ;;  %481 = vmatpush.bf16.msrb.mxu3 %v657_v32 }
  0x36   :  { %455 = vmatpush.bf16.msrb.mxu1 %v649_v33 }
  0x3e   :  { %690 = vmatmul.msk.bf16.vlgmr.msra.gmra.mxu0 %vm175_vm0, %v283_v34 }
  0x3f   :  { %691 = vmatmul.msk.bf16.vlgmr.msra.gmra.mxu1 %vm175_vm0, %v283_v34  ;;  %692 = vmatmul.msk.bf16.vlgmr.msra.gmra.mxu2 %vm175_vm0, %v283_v34 }
  0x40   :  { %693 = vmatmul.msk.bf16.vlgmr.msra.gmra.mxu3 %vm175_vm0, %v283_v34 }
  0x4e   :  { %694 = vmatmul.msk.bf16.vlgmr.msrb.gmra.mxu0 %vm175_vm0, %v283_v34 }
  0x4f   :  { %695 = vmatmul.msk.bf16.vlgmr.msrb.gmra.mxu1 %vm175_vm0, %v283_v34  ;;  %696 = vmatmul.msk.bf16.vlgmr.msrb.gmra.mxu2 %vm175_vm0, %v283_v34 }
  0x50   :  { %697 = vmatmul.msk.bf16.vlgmr.msrb.gmra.mxu3 %vm175_vm0, %v283_v34 }
  0x9b   :  { %v188_v23 = vpop.f32.mrf.mxu0 }
  0x9c   :  { %v201_v35 = vpop.f32.mrf.mxu1 }
  0xa2   :  { %v214_v36 = vpop.f32.mrf.mxu2 }
  0xa3   :  { %v227_v37 = vpop.f32.mrf.mxu3  ;;  %v190_v38 = vpop.f32.mrf.mxu0 }
  0xa4   :  { %v203_v39 = vpop.f32.mrf.mxu1 }
  0xaa   :  { %v216_v40 = vpop.f32.mrf.mxu2 }
  0xab   :  { %v229_v41 = vpop.f32.mrf.mxu3  ;;  %v240_v42 = vpop.f32.mrf.mxu0 }
  0xac   :  { %v253_v43 = vpop.f32.mrf.mxu1 }
  0xb2   :  { %v266_v44 = vpop.f32.mrf.mxu2 }
  0xb3   :  { %v279_v45 = vpop.f32.mrf.mxu3  ;;  %v242_v46 = vpop.f32.mrf.mxu0 }
  0xb4   :  { %v255_v47 = vpop.f32.mrf.mxu1 }
  0xba   :  { %v268_v48 = vpop.f32.mrf.mxu2 }
  0xbb   :  { %v281_v49 = vpop.f32.mrf.mxu3  ;;  %v392_v50 = vpop.f32.mrf.mxu0 }
  0xbc   :  { %v405_v51 = vpop.f32.mrf.mxu1  ;;  %v487_v52 = vmax.f32 %v392_v50, 0.0 }
  0xbd   :  { %v488_v53 = vmax.f32 %v405_v51, 0.0 }
  0xbe   :  { %v495_v59 = vmul.f32 %v487_v52, %v188_v23 }
  0xbf   :  { %v496_v60 = vmul.f32 %v488_v53, %v201_v35 }
  0xc1   :  { %v503_v62 = vadd.f32 %v496_v60, %v495_v59 }
  0xc2   :  { %v418_v54 = vpop.f32.mrf.mxu2 }
  0xc3   :  { %v489_v55 = vmax.f32 %v418_v54, 0.0  ;;  %v431_v56 = vpop.f32.mrf.mxu3  ;;  %v394_v57 = vpop.f32.mrf.mxu0 }
  0xc4   :  { %v407_v58 = vpop.f32.mrf.mxu1  ;;  %v490_v63 = vmax.f32 %v431_v56, 0.0 }
  0xc5   :  { %v497_v61 = vmul.f32 %v489_v55, %v214_v36 }
  0xc6   :  { %v498_v6 = vmul.f32 %v490_v63, %v227_v37 }
  0xc7   :  { %v504_v1 = vadd.f32 %v503_v62, %v497_v61 }
  0xc9   :  { %v505_v8 = vadd.f32 %v504_v1, %v498_v6 }
  0xca   :  { %v420_v0 = vpop.f32.mrf.mxu2 }
  0xcb   :  { %v433_v2 = vpop.f32.mrf.mxu3  ;;  %v444_v3 = vpop.f32.mrf.mxu0 }
  0xcc   :  { %v491_v4 = vmax.f32 %v444_v3, 0.0  ;;  %v457_v5 = vpop.f32.mrf.mxu1 }
  0xcd   :  { %v492_v9 = vmax.f32 %v457_v5, 0.0 }
  0xce   :  { %v499_v7 = vmul.f32 %v491_v4, %v240_v42 }
  0xcf   :  { %v500_v12 = vmul.f32 %v492_v9, %v253_v43 }
  0xd0   :  { %v506_v10 = vadd.f32 %v505_v8, %v499_v7 }
  0xd2   :  { %v470_v11 = vpop.f32.mrf.mxu2  ;;  %v507_v18 = vadd.f32 %v506_v10, %v500_v12 }
  0xd3   :  { %v493_v13 = vmax.f32 %v470_v11, 0.0  ;;  %v483_v14 = vpop.f32.mrf.mxu3  ;;  %v446_v15 = vpop.f32.mrf.mxu0 }
  0xd4   :  { %v494_v16 = vmax.f32 %v483_v14, 0.0  ;;  %v459_v17 = vpop.f32.mrf.mxu1 }
  0xd5   :  { %v501_v19 = vmul.f32 %v493_v13, %v266_v44 }
  0xd6   :  { %v502_v21 = vmul.f32 %v494_v16, %v279_v45 }
  0xd7   :  { %v508_v20 = vadd.f32 %v507_v18, %v501_v19 }
  0xd9   :  { %v509_v22 = vadd.f32 %v508_v20, %v502_v21 }
  0xda   :  { %v472_v24 = vpop.f32.mrf.mxu2 }
  0xdb   :  { %v485_v25 = vpop.f32.mrf.mxu3  ;;  %v510_v26 = vmul.f32 0.35355338, %v509_v22 }
  0xdd   :  { %511 = vrot.lane.b32.xlu0 %v510_v26, %s877_s2 }
 0x14f   :  { %v512_v27 = vpop.permute.xlu0 %511 }
 0x150   :  { %v513_v28 = vmax.f32 %v510_v26, %v512_v27 }
 0x152   :  { %514 = vrot.lane.b32.xlu0 %v513_v28, %s875_s0 }
 0x1c4   :  { %v515_v29 = vpop.permute.xlu0 %514 }
 0x1c5   :  { %v516_v30 = vmax.f32 %v513_v28, %v515_v29 }
 0x1c7   :  { %517 = vrot.lane.b32.xlu1 %v516_v30, %s878_s3 }
 0x239   :  { %v518_v31 = vpop.permute.xlu1 %517 }
 0x23a   :  { %v519_v32 = vmax.f32 %v516_v30, %v518_v31 }
 0x23c   :  { %v520_v33 = vsub.f32 %v510_v26, %v519_v32 }
 0x23e   :  { %v521_v34 = vmul.f32 1.442695, %v520_v33 }
 0x240   :  { %739 = vpow2.f32 %v521_v34 }
 0x246   :  { %v740_v23 = vpop.eup %739 }
 0x247   :  { %523 = vrot.lane.b32.xlu1 %v740_v23, %s877_s2 }
 0x2b9   :  { %v524_v35 = vpop.permute.xlu1 %523 }
 0x2ba   :  { %v525_v36 = vadd.f32 %v740_v23, %v524_v35 }
 0x2bc   :  { %526 = vrot.lane.b32.xlu2 %v525_v36, %s875_s0 }
 0x316   :  { %v527_v37 = vpop.permute.xlu2 %526 }
 0x317   :  { %v528_v38 = vadd.f32 %v527_v37, %v525_v36 }
 0x319   :  { %529 = vrot.lane.b32.xlu2 %v528_v38, %s878_s3 }
 0x373   :  { %v530_v39 = vpop.permute.xlu2 %529 }
 0x374   :  { %v531_v40 = vadd.f32 %v530_v39, %v528_v38 }
 0x376   :  { %741 = vrcp.f32 %v531_v40 }
 0x37c   :  { %v742_v41 = vpop.eup %741 }
 0x37d   :  { %v533_v42 = vmul.f32 %v742_v41, %v740_v23 }
 0x37f   :  { %534 = vst [vmem:[#allocation10] sm:$0xf] %v533_v42 }
 0x380   :  { %545 = dma.vmem_to_hbm [thread:$0]  %s541_s10, 64, %s543_s13, [#allocation4]  }
 0x381   :  { %869 = dma.done.wait [#allocation4], 64  }
 0x382   :  { %870 = vsyncadd [#allocation4], 4294967232 }
 0x383   :  { %550 = vsyncpa [#allocation3], 1 }
 0x384   :  { %551 = vsyncpa [#allocation6], 1 }
 0x385   :  { %552 = vsyncpa [#allocation9], 1 }
 0x386   :  { %553 = vsyncpa [#allocation4], 1 }

// kernel: tpu_custom_call.1
= control target key start
LH: loop header
LB: loop body
LE: loop exit
PB: predicated region body
PF: predicated region fallthrough
CT: control target
= control target key end

     0   :  { %9 = vsyncpa [#allocation3], 0  ;;  %s950_s0 = inlined_call_operand.hbm [shape: bf16[4,32], index: 0, kind: input, shape index: {}]   ;;  %s951_s1 = inlined_call_operand.hbm [shape: bf16[4,32], index: 1, kind: input, shape index: {}]   ;;  %s952_s2 = inlined_call_operand.hbm [shape: bf16[32,1024], index: 2, kind: input, shape index: {}]   ;;  %s953_s3 = inlined_call_operand.hbm [shape: bf16[32,1024], index: 3, kind: input, shape index: {}]   ;;  %s954_s4 = inlined_call_operand.hbm [shape: f32[4,128], index: 4, kind: output, shape index: {}]  }
   0x1   :  { %10 = vsyncpa [#allocation6], 0 }
   0x2   :  { %11 = vsyncpa [#allocation9], 0  ;;  %s29_s17 = sshll.u32 %s951_s1, 4  ;;  %s30_s17 = int_to_ptr.hbm [resolvable:$true] %s29_s17 }
   0x3   :  { %12 = vsyncpa [#allocation4], 0  ;;  %s871_s18 = smov [#allocation5]   ;;  %s18_s22 = sshll.u32 %s950_s0, 4  ;;  %s19_s22 = int_to_ptr.hbm [resolvable:$true] %s18_s22 }
   0x4   :  { %s31_s19 = sshll.u32 %s871_s18, 4  ;;  %s872_s23 = smov [#allocation2]   ;;  %s32_s19 = int_to_ptr.vmem [resolvable:$true] %s31_s19 }
   0x5   :  { %34 = dma.hbm_to_vmem [thread:$0]  %s30_s17, 32, %s32_s19, [#allocation6]  }
   0x6   :  { %s20_s24 = sshll.u32 %s872_s23, 4  ;;  %s39_s27 = sshll.u32 %s952_s2, 4  ;;  %s21_s24 = int_to_ptr.vmem [resolvable:$true] %s20_s24  ;;  %s40_s27 = int_to_ptr.hbm [resolvable:$true] %s39_s27 }
   0x7   :  { %23 = dma.hbm_to_vmem [thread:$0]  %s19_s22, 32, %s21_s24, [#allocation3]  }
   0x8   :  { %s873_s1 = smov [#allocation7]   ;;  %s52_s5 = sshll.u32 %s953_s3, 4  ;;  %s53_s5 = int_to_ptr.hbm [resolvable:$true] %s52_s5 }
   0x9   :  { %s41_s28 = sshll.u32 %s873_s1, 4  ;;  %s874_s6 = smov 512   ;;  %s42_s28 = int_to_ptr.vmem [resolvable:$true] %s41_s28 }
   0xa   :  { %s875_s0 = smov 32   ;;  %s876_s7 = smov [#allocation8]  }
   0xb   :  { %47 = dma.hbm_to_vmem [thread:$0]  %s40_s27, 2048, %s42_s28, [#allocation6], %s874_s6, %s874_s6, %s875_s0  }
   0xc   :  { %s54_s8 = sshll.u32 %s876_s7, 4  ;;  %s55_s8 = int_to_ptr.vmem [resolvable:$true] %s54_s8 }
   0xd   :  { %60 = dma.hbm_to_vmem [thread:$0]  %s53_s5, 2048, %s55_s8, [#allocation9], %s874_s6, %s874_s6, %s875_s0  }
   0xe   :  { %863 = dma.done.wait [#allocation3], 32  }
   0xf   :  { %864 = vsyncadd [#allocation3], 4294967264 }
  0x10   :  { %865 = dma.done.wait [#allocation6], 2080  }
  0x11   :  { %866 = vsyncadd [#allocation6], 4294965216 }
  0x12   :  { %867 = dma.done.wait [#allocation9], 2048  }
  0x13   :  { %868 = vsyncadd [#allocation9], 4294965248  ;;  %vm175_vm0 = vcmask 261120   ;;  %v588_v0 = vld [vmem:[#allocation7 + $0x40] sm:$0xf]  ;;  %s877_s2 = smov 16  }
  0x14   :  { %v710_v1 = vld [vmem:[#allocation7 + $0x5c] sm:$0xf0]  ;;  %v706_v2 = vld [vmem:[#allocation7 + $0x44] sm:$0xf]  ;;  %v596_v5 = vld [vmem:[#allocation7 + $0x48] sm:$0xf] }
  0x15   :  { %v589_v3 = vor.u32 %v710_v1, %v588_v0  ;;  %v590_v4 = vld [vmem:[#allocation7 + $0x60] sm:$0xf0]  ;;  %v711_v6 = vld [vmem:[#allocation7 + $0x64] sm:$0xf0]  ;;  %v707_v9 = vld [vmem:[#allocation7 + $0x4c] sm:$0xf] }
  0x16   :  { %v593_v7 = vor.u32 %v706_v2, %v590_v4  ;;  %v597_v8 = vor.u32 %v711_v6, %v596_v5  ;;  %v598_v10 = vld [vmem:[#allocation7 + $0x68] sm:$0xf0]  ;;  %v556_v11 = vld [vmem:[#allocation7] sm:$0xf]  ;;  %v698_v14 = vld [vmem:[#allocation7 + $0x4] sm:$0xf] }
  0x17   :  { %185 = vmatpush.bf16.msra.mxu0 %v589_v3  ;;  %v601_v12 = vor.u32 %v707_v9, %v598_v10  ;;  %v702_v13 = vld [vmem:[#allocation7 + $0x1c] sm:$0xf0]  ;;  %v558_v15 = vld [vmem:[#allocation7 + $0x20] sm:$0xf0]  ;;  %v564_v18 = vld [vmem:[#allocation7 + $0x8] sm:$0xf] }
  0x18   :  { %198 = vmatpush.bf16.msra.mxu1 %v593_v7  ;;  %211 = vmatpush.bf16.msra.mxu2 %v597_v8  ;;  %v557_v16 = vor.u32 %v702_v13, %v556_v11  ;;  %v561_v17 = vor.u32 %v698_v14, %v558_v15  ;;  %v703_v19 = vld [vmem:[#allocation7 + $0x24] sm:$0xf0]  ;;  %v699_v20 = vld [vmem:[#allocation7 + $0xc] sm:$0xf]  ;;  %v919_v23 = vld [vmem:[#allocation2] sm:$0x3] }
  0x19   :  { %224 = vmatpush.bf16.msra.mxu3 %v601_v12  ;;  %v565_v21 = vor.u32 %v703_v19, %v564_v18  ;;  %v566_v22 = vld [vmem:[#allocation7 + $0x28] sm:$0xf0]  ;;  %v612_v24 = vld [vmem:[#allocation7 + $0x58] sm:$0xf]  ;;  %v604_v27 = vld [vmem:[#allocation7 + $0x50] sm:$0xf] }
  0x1a   :  { %v569_v25 = vor.u32 %v699_v20, %v566_v22  ;;  %v713_v26 = vld [vmem:[#allocation7 + $0x74] sm:$0xf0]  ;;  %v712_v28 = vld [vmem:[#allocation7 + $0x6c] sm:$0xf0]  ;;  %v709_v30 = vld [vmem:[#allocation7 + $0x5c] sm:$0xf] }
  0x1b   :  { %186 = vmatpush.bf16.msra.mxu0 %v557_v16  ;;  %v613_v29 = vor.u32 %v713_v26, %v612_v24  ;;  %v614_v31 = vld [vmem:[#allocation7 + $0x78] sm:$0xf0]  ;;  %v708_v32 = vld [vmem:[#allocation7 + $0x54] sm:$0xf]  ;;  %v605_v33 = vor.u32 %v712_v28, %v604_v27  ;;  %v580_v36 = vld [vmem:[#allocation7 + $0x18] sm:$0xf] }
  0x1c   :  { %199 = vmatpush.bf16.msra.mxu1 %v561_v17  ;;  %212 = vmatpush.bf16.msra.mxu2 %v565_v21  ;;  %v617_v34 = vor.u32 %v709_v30, %v614_v31  ;;  %v606_v35 = vld [vmem:[#allocation7 + $0x70] sm:$0xf0]  ;;  %v705_v37 = vld [vmem:[#allocation7 + $0x34] sm:$0xf0]  ;;  %v572_v40 = vld [vmem:[#allocation7 + $0x10] sm:$0xf] }
  0x1d   :  { %225 = vmatpush.bf16.msra.mxu3 %v569_v25  ;;  %v609_v38 = vor.u32 %v708_v32, %v606_v35  ;;  %v581_v39 = vor.u32 %v705_v37, %v580_v36  ;;  %v704_v41 = vld [vmem:[#allocation7 + $0x2c] sm:$0xf0]  ;;  %v701_v42 = vld [vmem:[#allocation7 + $0x1c] sm:$0xf]  ;;  %v700_v44 = vld [vmem:[#allocation7 + $0x14] sm:$0xf] }
  0x1e   :  { %618 = vmatmul.msk.bf16.vlgmr.msra.gmra.mxu0 %vm175_vm0, %v919_v23  ;;  %v582_v43 = vld [vmem:[#allocation7 + $0x38] sm:$0xf0]  ;;  %v574_v45 = vld [vmem:[#allocation7 + $0x30] sm:$0xf0]  ;;  %v668_v47 = vld [vmem:[#allocation8 + $0x48] sm:$0xf]  ;;  %v573_v50 = vor.u32 %v704_v41, %v572_v40 }
  0x1f   :  { %619 = vmatmul.msk.bf16.vlgmr.msra.gmra.mxu1 %vm175_vm0, %v919_v23  ;;  %620 = vmatmul.msk.bf16.vlgmr.msra.gmra.mxu2 %vm175_vm0, %v919_v23  ;;  %v585_v46 = vor.u32 %v701_v42, %v582_v43  ;;  %v727_v48 = vld [vmem:[#allocation8 + $0x64] sm:$0xf0]  ;;  %v660_v49 = vld [vmem:[#allocation8 + $0x40] sm:$0xf]  ;;  %v723_v53 = vld [vmem:[#allocation8 + $0x4c] sm:$0xf]  ;;  %v577_v55 = vor.u32 %v700_v44, %v574_v45 }
  0x20   :  { %263 = vmatpush.bf16.msrb.mxu2 %v613_v29  ;;  %621 = vmatmul.msk.bf16.vlgmr.msra.gmra.mxu3 %vm175_vm0, %v919_v23  ;;  %v669_v51 = vor.u32 %v727_v48, %v668_v47  ;;  %v726_v52 = vld [vmem:[#allocation8 + $0x5c] sm:$0xf0]  ;;  %v670_v54 = vld [vmem:[#allocation8 + $0x68] sm:$0xf0]  ;;  %v722_v58 = vld [vmem:[#allocation8 + $0x44] sm:$0xf] }
  0x21   :  { %276 = vmatpush.bf16.msrb.mxu3 %v617_v34  ;;  %237 = vmatpush.bf16.msrb.mxu0 %v605_v33  ;;  %v661_v56 = vor.u32 %v726_v52, %v660_v49  ;;  %v673_v57 = vor.u32 %v723_v53, %v670_v54  ;;  %v662_v59 = vld [vmem:[#allocation8 + $0x60] sm:$0xf0]  ;;  %v636_v60 = vld [vmem:[#allocation8 + $0x8] sm:$0xf]  ;;  %v628_v63 = vld [vmem:[#allocation8] sm:$0xf] }
  0x22   :  { %250 = vmatpush.bf16.msrb.mxu1 %v609_v38  ;;  %v665_v61 = vor.u32 %v722_v58, %v662_v59  ;;  %v719_v62 = vld [vmem:[#allocation8 + $0x24] sm:$0xf0]  ;;  %v718_v0 = vld [vmem:[#allocation8 + $0x1c] sm:$0xf0]  ;;  %v715_v2 = vld [vmem:[#allocation8 + $0xc] sm:$0xf] }
  0x23   :  { %v637_v1 = vor.u32 %v719_v62, %v636_v60  ;;  %v638_v3 = vld [vmem:[#allocation8 + $0x28] sm:$0xf0]  ;;  %v714_v4 = vld [vmem:[#allocation8 + $0x4] sm:$0xf]  ;;  %v629_v7 = vor.u32 %v718_v0, %v628_v63  ;;  %v684_v9 = vld [vmem:[#allocation8 + $0x58] sm:$0xf] }
  0x24   :  { %264 = vmatpush.bf16.msrb.mxu2 %v581_v39  ;;  %v641_v5 = vor.u32 %v715_v2, %v638_v3  ;;  %v630_v6 = vld [vmem:[#allocation8 + $0x20] sm:$0xf0]  ;;  %v729_v10 = vld [vmem:[#allocation8 + $0x74] sm:$0xf0]  ;;  %v676_v11 = vld [vmem:[#allocation8 + $0x50] sm:$0xf] }
  0x25   :  { %277 = vmatpush.bf16.msrb.mxu3 %v585_v46  ;;  %238 = vmatpush.bf16.msrb.mxu0 %v573_v50  ;;  %v633_v8 = vor.u32 %v714_v4, %v630_v6  ;;  %v728_v12 = vld [vmem:[#allocation8 + $0x6c] sm:$0xf0]  ;;  %v725_v13 = vld [vmem:[#allocation8 + $0x5c] sm:$0xf]  ;;  %v724_v15 = vld [vmem:[#allocation8 + $0x54] sm:$0xf]  ;;  %v685_v17 = vor.u32 %v729_v10, %v684_v9 }
  0x26   :  { %251 = vmatpush.bf16.msrb.mxu1 %v577_v55  ;;  %v686_v14 = vld [vmem:[#allocation8 + $0x78] sm:$0xf0]  ;;  %v678_v16 = vld [vmem:[#allocation8 + $0x70] sm:$0xf0]  ;;  %v677_v18 = vor.u32 %v728_v12, %v676_v11  ;;  %v652_v20 = vld [vmem:[#allocation8 + $0x18] sm:$0xf] }
  0x27   :  { %v689_v19 = vor.u32 %v725_v13, %v686_v14  ;;  %v721_v21 = vld [vmem:[#allocation8 + $0x34] sm:$0xf0]  ;;  %v644_v22 = vld [vmem:[#allocation8 + $0x10] sm:$0xf]  ;;  %v681_v24 = vor.u32 %v724_v15, %v678_v16  ;;  %v717_v26 = vld [vmem:[#allocation8 + $0x1c] sm:$0xf] }
  0x28   :  { %415 = vmatpush.bf16.msra.mxu2 %v669_v51  ;;  %v720_v25 = vld [vmem:[#allocation8 + $0x2c] sm:$0xf0]  ;;  %v654_v27 = vld [vmem:[#allocation8 + $0x38] sm:$0xf0]  ;;  %v716_v28 = vld [vmem:[#allocation8 + $0x14] sm:$0xf]  ;;  %v653_v30 = vor.u32 %v721_v21, %v652_v20 }
  0x29   :  { %428 = vmatpush.bf16.msra.mxu3 %v673_v57  ;;  %389 = vmatpush.bf16.msra.mxu0 %v661_v56  ;;  %v646_v29 = vld [vmem:[#allocation8 + $0x30] sm:$0xf0]  ;;  %v645_v31 = vor.u32 %v720_v25, %v644_v22  ;;  %v657_v32 = vor.u32 %v717_v26, %v654_v27  ;;  %v283_v34 = vld [vmem:[#allocation5] sm:$0x3]  ;;  %s878_s3 = smov 64   ;;  %s879_s9 = smov [#allocation10]  }
  0x2a   :  { %402 = vmatpush.bf16.msra.mxu1 %v665_v61  ;;  %v649_v33 = vor.u32 %v716_v28, %v646_v29  ;;  %s540_s10 = sshll.u32 %s879_s9, 4  ;;  %s542_s13 = sshll.u32 %s954_s4, 4  ;;  %s541_s10 = int_to_ptr.vmem [resolvable:$true] %s540_s10  ;;  %s543_s13 = int_to_ptr.hbm [resolvable:$true] %s542_s13 }
  0x2c   :  { %416 = vmatpush.bf16.msra.mxu2 %v637_v1 }
  0x2d   :  { %429 = vmatpush.bf16.msra.mxu3 %v641_v5  ;;  %390 = vmatpush.bf16.msra.mxu0 %v629_v7 }
  0x2e   :  { %403 = vmatpush.bf16.msra.mxu1 %v633_v8  ;;  %622 = vmatmul.msk.bf16.vlgmr.msrb.gmra.mxu0 %vm175_vm0, %v919_v23 }
  0x2f   :  { %623 = vmatmul.msk.bf16.vlgmr.msrb.gmra.mxu1 %vm175_vm0, %v919_v23  ;;  %624 = vmatmul.msk.bf16.vlgmr.msrb.gmra.mxu2 %vm175_vm0, %v919_v23 }
  0x30   :  { %625 = vmatmul.msk.bf16.vlgmr.msrb.gmra.mxu3 %vm175_vm0, %v919_v23  ;;  %467 = vmatpush.bf16.msrb.mxu2 %v685_v17 }
  0x31   :  { %441 = vmatpush.bf16.msrb.mxu0 %v677_v18  ;;  %480 = vmatpush.bf16.msrb.mxu3 %v689_v19 }
  0x32   :  { %454 = vmatpush.bf16.msrb.mxu1 %v681_v24 }
  0x34   :  { %468 = vmatpush.bf16.msrb.mxu2 %v653_v30 }
  0x35   :  { %442 = vmatpush.bf16.msrb.mxu0 %v645_v31  ;;  %481 = vmatpush.bf16.msrb.mxu3 %v657_v32 }
  0x36   :  { %455 = vmatpush.bf16.msrb.mxu1 %v649_v33 }
  0x3e   :  { %690 = vmatmul.msk.bf16.vlgmr.msra.gmra.mxu0 %vm175_vm0, %v283_v34 }
  0x3f   :  { %691 = vmatmul.msk.bf16.vlgmr.msra.gmra.mxu1 %vm175_vm0, %v283_v34  ;;  %692 = vmatmul.msk.bf16.vlgmr.msra.gmra.mxu2 %vm175_vm0, %v283_v34 }
  0x40   :  { %693 = vmatmul.msk.bf16.vlgmr.msra.gmra.mxu3 %vm175_vm0, %v283_v34 }
  0x4e   :  { %694 = vmatmul.msk.bf16.vlgmr.msrb.gmra.mxu0 %vm175_vm0, %v283_v34 }
  0x4f   :  { %695 = vmatmul.msk.bf16.vlgmr.msrb.gmra.mxu1 %vm175_vm0, %v283_v34  ;;  %696 = vmatmul.msk.bf16.vlgmr.msrb.gmra.mxu2 %vm175_vm0, %v283_v34 }
  0x50   :  { %697 = vmatmul.msk.bf16.vlgmr.msrb.gmra.mxu3 %vm175_vm0, %v283_v34 }
  0x9b   :  { %v188_v23 = vpop.f32.mrf.mxu0 }
  0x9c   :  { %v201_v35 = vpop.f32.mrf.mxu1 }
  0xa2   :  { %v214_v36 = vpop.f32.mrf.mxu2 }
  0xa3   :  { %v227_v37 = vpop.f32.mrf.mxu3  ;;  %v190_v38 = vpop.f32.mrf.mxu0 }
  0xa4   :  { %v203_v39 = vpop.f32.mrf.mxu1 }
  0xaa   :  { %v216_v40 = vpop.f32.mrf.mxu2 }
  0xab   :  { %v229_v41 = vpop.f32.mrf.mxu3  ;;  %v240_v42 = vpop.f32.mrf.mxu0 }
  0xac   :  { %v253_v43 = vpop.f32.mrf.mxu1 }
  0xb2   :  { %v266_v44 = vpop.f32.mrf.mxu2 }
  0xb3   :  { %v279_v45 = vpop.f32.mrf.mxu3  ;;  %v242_v46 = vpop.f32.mrf.mxu0 }
  0xb4   :  { %v255_v47 = vpop.f32.mrf.mxu1 }
  0xba   :  { %v268_v48 = vpop.f32.mrf.mxu2 }
  0xbb   :  { %v281_v49 = vpop.f32.mrf.mxu3  ;;  %v392_v50 = vpop.f32.mrf.mxu0 }
  0xbc   :  { %v405_v51 = vpop.f32.mrf.mxu1  ;;  %v487_v52 = vmax.f32 %v392_v50, 0.0 }
  0xbd   :  { %v488_v53 = vmax.f32 %v405_v51, 0.0 }
  0xbe   :  { %v495_v59 = vmul.f32 %v487_v52, %v188_v23 }
  0xbf   :  { %v496_v60 = vmul.f32 %v488_v53, %v201_v35 }
  0xc1   :  { %v503_v62 = vadd.f32 %v496_v60, %v495_v59 }
  0xc2   :  { %v418_v54 = vpop.f32.mrf.mxu2 }
  0xc3   :  { %v489_v55 = vmax.f32 %v418_v54, 0.0  ;;  %v431_v56 = vpop.f32.mrf.mxu3  ;;  %v394_v57 = vpop.f32.mrf.mxu0 }
  0xc4   :  { %v407_v58 = vpop.f32.mrf.mxu1  ;;  %v490_v63 = vmax.f32 %v431_v56, 0.0 }
  0xc5   :  { %v497_v61 = vmul.f32 %v489_v55, %v214_v36 }
  0xc6   :  { %v498_v6 = vmul.f32 %v490_v63, %v227_v37 }
  0xc7   :  { %v504_v1 = vadd.f32 %v503_v62, %v497_v61 }
  0xc9   :  { %v505_v8 = vadd.f32 %v504_v1, %v498_v6 }
  0xca   :  { %v420_v0 = vpop.f32.mrf.mxu2 }
  0xcb   :  { %v433_v2 = vpop.f32.mrf.mxu3  ;;  %v444_v3 = vpop.f32.mrf.mxu0 }
  0xcc   :  { %v491_v4 = vmax.f32 %v444_v3, 0.0  ;;  %v457_v5 = vpop.f32.mrf.mxu1 }
  0xcd   :  { %v492_v9 = vmax.f32 %v457_v5, 0.0 }
  0xce   :  { %v499_v7 = vmul.f32 %v491_v4, %v240_v42 }
  0xcf   :  { %v500_v12 = vmul.f32 %v492_v9, %v253_v43 }
  0xd0   :  { %v506_v10 = vadd.f32 %v505_v8, %v499_v7 }
  0xd2   :  { %v470_v11 = vpop.f32.mrf.mxu2  ;;  %v507_v18 = vadd.f32 %v506_v10, %v500_v12 }
  0xd3   :  { %v493_v13 = vmax.f32 %v470_v11, 0.0  ;;  %v483_v14 = vpop.f32.mrf.mxu3  ;;  %v446_v15 = vpop.f32.mrf.mxu0 }
  0xd4   :  { %v494_v16 = vmax.f32 %v483_v14, 0.0  ;;  %v459_v17 = vpop.f32.mrf.mxu1 }
  0xd5   :  { %v501_v19 = vmul.f32 %v493_v13, %v266_v44 }
  0xd6   :  { %v502_v21 = vmul.f32 %v494_v16, %v279_v45 }
  0xd7   :  { %v508_v20 = vadd.f32 %v507_v18, %v501_v19 }
  0xd9   :  { %v509_v22 = vadd.f32 %v508_v20, %v502_v21 }
  0xda   :  { %v472_v24 = vpop.f32.mrf.mxu2 }
  0xdb   :  { %v485_v25 = vpop.f32.mrf.mxu3  ;;  %v510_v26 = vmul.f32 0.35355338, %v509_v22 }
  0xdd   :  { %511 = vrot.lane.b32.xlu0 %v510_v26, %s877_s2 }
 0x14f   :  { %v512_v27 = vpop.permute.xlu0 %511 }
 0x150   :  { %v513_v28 = vmax.f32 %v510_v26, %v512_v27 }
 0x152   :  { %514 = vrot.lane.b32.xlu0 %v513_v28, %s875_s0 }
 0x1c4   :  { %v515_v29 = vpop.permute.xlu0 %514 }
 0x1c5   :  { %v516_v30 = vmax.f32 %v513_v28, %v515_v29 }
 0x1c7   :  { %517 = vrot.lane.b32.xlu1 %v516_v30, %s878_s3 }
 0x239   :  { %v518_v31 = vpop.permute.xlu1 %517 }
 0x23a   :  { %v519_v32 = vmax.f32 %v516_v30, %v518_v31 }
 0x23c   :  { %v520_v33 = vsub.f32 %v510_v26, %v519_v32 }
 0x23e   :  { %v521_v34 = vmul.f32 1.442695, %v520_v33 }
 0x240   :  { %739 = vpow2.f32 %v521_v34 }
 0x246   :  { %v740_v23 = vpop.eup %739 }
 0x247   :  { %523 = vrot.lane.b32.xlu1 %v740_v23, %s877_s2 }
 0x2b9   :  { %v524_v35 = vpop.permute.xlu1 %523 }
 0x2ba   :  { %v525_v36 = vadd.f32 %v740_v23, %v524_v35 }
 0x2bc   :  { %526 = vrot.lane.b32.xlu2 %v525_v36, %s875_s0 }
 0x316   :  { %v527_v37 = vpop.permute.xlu2 %526 }
 0x317   :  { %v528_v38 = vadd.f32 %v527_v37, %v525_v36 }
 0x319   :  { %529 = vrot.lane.b32.xlu2 %v528_v38, %s878_s3 }
 0x373   :  { %v530_v39 = vpop.permute.xlu2 %529 }
 0x374   :  { %v531_v40 = vadd.f32 %v530_v39, %v528_v38 }
 0x376   :  { %741 = vrcp.f32 %v531_v40 }
 0x37c   :  { %v742_v41 = vpop.eup %741 }
 0x37d   :  { %v533_v42 = vmul.f32 %v742_v41, %v740_v23 }
 0x37f   :  { %534 = vst [vmem:[#allocation10] sm:$0xf] %v533_v42 }
 0x380   :  { %545 = dma.vmem_to_hbm [thread:$0]  %s541_s10, 64, %s543_s13, [#allocation4]  }
 0x381   :  { %869 = dma.done.wait [#allocation4], 64  }
 0x382   :  { %870 = vsyncadd [#allocation4], 4294967232 }
 0x383   :  { %550 = vsyncpa [#allocation3], 1 }
 0x384   :  { %551 = vsyncpa [#allocation6], 1 }
 0x385   :  { %552 = vsyncpa [#allocation9], 1 }
 0x386   :  { %553 = vsyncpa [#allocation4], 1 }

</bundles_post_ra>
